<compile_context>
chip_gen: v7x
topology: tpu7x:2x2x1
jax: 0.10.0
libtpu: 0.0.40
codegen_flags: <defaults>
</compile_context>

<pallas_src>
import functools

import jax
import jax.numpy as jnp
from jax.experimental import pallas as pl
from jax.experimental.pallas import tpu as pltpu


# Constant buffer of the PyTorch OutputActivation module (implies pl_dim == 3).
THRESHOLD = (0.0, -1.0, 0.0)


def _round_up(x, m):
    return ((x + m - 1) // m) * m


def _leaky_relu(v, slope=0.01):
    # nn.LeakyReLU default negative_slope = 0.01
    return jnp.where(v >= 0, v, slope * v)


def plant_kernel(op_ref, plv_ref,
                 w1o_ref, w1p_ref, b1_ref,
                 w2_ref, b2_ref,
                 w3_ref, b3_ref,
                 w4_ref, b4_ref,
                 out_ref, *, thr_vals):
    """Feature-major fused MLP.

    op_ref : (op_dim, TB)   plv_ref : (pl_dim, TB)    out_ref : (pl_dim, TB)
    wN_ref : transposed, folded weights (out_features, in_features); bN_ref: (out, 1).
    """
    cdt = w2_ref.dtype                      # MXU operand dtype (f32, or bf16 fast path)

    plv = plv_ref[...]                      # keep f32 for the residual add
    op = op_ref[...].astype(cdt)

    # layer 1: split-K Linear (op part + pl part); BN/bias already folded into (W', b').
    h = (jnp.dot(w1o_ref[...], op, preferred_element_type=jnp.float32)
         + jnp.dot(w1p_ref[...], plv.astype(cdt), preferred_element_type=jnp.float32)
         + b1_ref[...])
    h = _leaky_relu(h)

    # layer 2 (folded)
    h = _leaky_relu(jnp.dot(w2_ref[...], h.astype(cdt),
                            preferred_element_type=jnp.float32) + b2_ref[...])

    # layer 3 (folded)
    h = _leaky_relu(jnp.dot(w3_ref[...], h.astype(cdt),
                            preferred_element_type=jnp.float32) + b3_ref[...])

    # output layer: Linear -> OutputActivation (elementwise max with per-row threshold)
    y = jnp.dot(w4_ref[...], h.astype(cdt),
                preferred_element_type=jnp.float32) + b4_ref[...]

    # Bake the constant threshold in-kernel: rows (sublanes) are output features.
    row = jax.lax.broadcasted_iota(jnp.int32, y.shape, 0)
    thr = jnp.full(y.shape, float(thr_vals[0]), jnp.float32)
    for i in range(1, len(thr_vals)):
        thr = jnp.where(row == i, float(thr_vals[i]), thr)
    y = jnp.maximum(y, thr)

    # residual: pl + net(cat(op_in, pl))
    out_ref[...] = plv + y


def fold_params(params, op_in_dim, *, use_bf16=False):
    """Fold eval-mode BN affine + bias into the weights; transpose to feature-major."""
    def fold(w, b, s, t):
        return w * s, b * s + t             # s, t: (1, hidden) -> broadcast

    w1f, b1f = fold(params["w1"], params["b1"], params["s1"], params["t1"])
    w2f, b2f = fold(params["w2"], params["b2"], params["s2"], params["t2"])
    w3f, b3f = fold(params["w3"], params["b3"], params["s3"], params["t3"])

    wdt = jnp.bfloat16 if use_bf16 else jnp.float32
    T = lambda w: jnp.asarray(w.T, dtype=wdt)            # (out, in), MXU operand dtype
    col = lambda b: jnp.asarray(b.T, dtype=jnp.float32)   # (out, 1), biases stay f32

    return dict(
        w1o_t=T(w1f[:op_in_dim]), w1p_t=T(w1f[op_in_dim:]), b1=col(b1f),
        w2_t=T(w2f), b2=col(b2f),
        w3_t=T(w3f), b3=col(b3f),
        w4_t=T(params["w4"]), b4=col(params["b4"]),
    )


def plant_model_forward(op_in, pl_in, params, *, max_tile=8192, use_bf16=False):
    """op_in: (B, op_in_dim) f32, pl_in: (B, pl_dim) f32 -> (B, pl_dim) f32."""
    B, op_dim = op_in.shape
    pl_dim = pl_in.shape[1]
    assert pl_dim == len(THRESHOLD), "OutputActivation threshold requires pl_dim == 3"
    fp = fold_params(params, op_dim, use_bf16=use_bf16)

    # Feature-major presentation: batch on the lane axis -> lane-dense DMAs / stores.
    op_t = op_in.T                           # (op_dim, B)
    pl_t = pl_in.T                           # (pl_dim, B)

    # Batch tile: multiple of 128 lanes, as large as possible to amortize the ~0.35us
    # per-grid-step overhead. No padding: the ragged last block is clipped by Pallas.
    tb = min(max_tile, _round_up(B, 128))
    steps = pl.cdiv(B, tb)
    # v7x megacore: prefer an even number of grid steps so both TensorCores get
    # balanced work (no-op for v5e/v6e single-core).
    if steps > 1 and steps % 2 == 1:
        tb_even = _round_up(pl.cdiv(B, steps + 1), 128)
        if pl.cdiv(B, tb_even) % 2 == 0:
            tb = tb_even
            steps = pl.cdiv(B, tb)

    weight_args = (
        fp["w1o_t"], fp["w1p_t"], fp["b1"],
        fp["w2_t"], fp["b2"],
        fp["w3_t"], fp["b3"],
        fp["w4_t"], fp["b4"],
    )

    def batch_spec(d):
        return pl.BlockSpec((d, tb), lambda i: (0, i))

    def const_spec(a):
        return pl.BlockSpec(a.shape, lambda i: (0, 0))

    kernel = functools.partial(plant_kernel, thr_vals=THRESHOLD)

    out_t = pl.pallas_call(
        kernel,
        out_shape=jax.ShapeDtypeStruct((pl_dim, B), jnp.float32),
        grid=(steps,),
        in_specs=[batch_spec(op_dim), batch_spec(pl_dim)]
                 + [const_spec(w) for w in weight_args],
        out_specs=batch_spec(pl_dim),
        compiler_params=pltpu.CompilerParams(
            dimension_semantics=("parallel",)),
    )(op_t, pl_t, *weight_args)

    return out_t.T


def init_params(op_in_dim, pl_dim, hidden=64, key=None):
    """Deterministic parameter init matching the PyTorch module's shapes."""
    if key is None:
        key = jax.random.PRNGKey(0)
    keys = jax.random.split(key, 16)
    d_in = op_in_dim + pl_dim
    eps = 1e-5

    def linear(kw, kb, fan_in, fan_out):
        bound = 1.0 / jnp.sqrt(fan_in)
        w = jax.random.uniform(kw, (fan_in, fan_out), jnp.float32, -bound, bound)
        b = jax.random.uniform(kb, (1, fan_out), jnp.float32, -bound, bound)
        return w, b

    def bn_fold(kg, kb, n):
        gamma = 1.0 + 0.1 * jax.random.normal(kg, (1, n), jnp.float32)
        beta = 0.1 * jax.random.normal(kb, (1, n), jnp.float32)
        running_mean = jnp.zeros((1, n), jnp.float32)
        running_var = jnp.ones((1, n), jnp.float32)
        scale = gamma / jnp.sqrt(running_var + eps)
        shift = beta - running_mean * scale
        return scale, shift

    w1, b1 = linear(keys[0], keys[1], d_in, hidden)
    s1, t1 = bn_fold(keys[2], keys[3], hidden)
    w2, b2 = linear(keys[4], keys[5], hidden, hidden)
    s2, t2 = bn_fold(keys[6], keys[7], hidden)
    w3, b3 = linear(keys[8], keys[9], hidden, hidden)
    s3, t3 = bn_fold(keys[10], keys[11], hidden)
    w4, b4 = linear(keys[12], keys[13], hidden, pl_dim)

    return dict(w1=w1, b1=b1, s1=s1, t1=t1,
                w2=w2, b2=b2, s2=s2, t2=t2,
                w3=w3, b3=b3, s3=s3, t3=t3,
                w4=w4, b4=b4)


def reference_forward(op_in, pl_in, p):
    """Pure-JAX reference with the original (unfolded, batch-major) semantics."""
    thr = jnp.asarray([list(THRESHOLD)], dtype=jnp.float32)
    x = jnp.concatenate([op_in, pl_in], axis=1)
    h = _leaky_relu((x @ p["w1"] + p["b1"]) * p["s1"] + p["t1"])
    h = _leaky_relu((h @ p["w2"] + p["b2"]) * p["s2"] + p["t2"])
    h = _leaky_relu((h @ p["w3"] + p["b3"]) * p["s3"] + p["t3"])
    y = jnp.maximum(h @ p["w4"] + p["b4"], thr)
    return pl_in + y


if __name__ == "__main__":
    op_in_dim, pl_dim, batch = 5, 3, 8

    key = jax.random.PRNGKey(0)
    k_op, k_pl, k_param = jax.random.split(key, 3)
    op_in = jax.random.normal(k_op, (batch, op_in_dim), dtype=jnp.float32)
    pl_in = jax.random.normal(k_pl, (batch, pl_dim), dtype=jnp.float32)

    params = init_params(op_in_dim, pl_dim, hidden=64, key=k_param)

    out = jax.block_until_ready(plant_model_forward(op_in, pl_in, params))
    ref = reference_forward(op_in, pl_in, params)
    assert out.shape == (batch, pl_dim)
    assert jnp.allclose(out, ref, atol=2e-5, rtol=2e-5)

    # multi-tile + ragged (non-128-multiple) batch, forcing >1 grid step and the
    # even-step adjustment / clipped last block.
    batch2 = 2500
    k_op2, k_pl2 = jax.random.split(jax.random.PRNGKey(1))
    op2 = jax.random.normal(k_op2, (batch2, op_in_dim), dtype=jnp.float32)
    pl2 = jax.random.normal(k_pl2, (batch2, pl_dim), dtype=jnp.float32)
    out2 = jax.block_until_ready(plant_model_forward(op2, pl2, params, max_tile=1024))
    ref2 = reference_forward(op2, pl2, params)
    assert out2.shape == (batch2, pl_dim)
    assert jnp.allclose(out2, ref2, atol=2e-5, rtol=2e-5)

    # optional bf16 MXU-operand fast path (v6e/v7x); f32 accumulation, loose tolerance.
    out3 = jax.block_until_ready(plant_model_forward(op2, pl2, params, use_bf16=True))
    assert out3.shape == (batch2, pl_dim)
    assert jnp.allclose(out3, ref2, atol=1e-1, rtol=1e-1)

    print("KERNEL_OK")
</pallas_src>

<mosaic_0001>
module attributes {stable_mosaic.version = 11 : i64} {
  func.func @plant_kernel(%arg0: i32, %arg1: memref<5x128xf32, #tpu.memory_space<vmem>>, %arg2: memref<3x128xf32, #tpu.memory_space<vmem>>, %arg3: memref<64x5xf32, #tpu.memory_space<vmem>>, %arg4: memref<64x3xf32, #tpu.memory_space<vmem>>, %arg5: memref<64x1xf32, #tpu.memory_space<vmem>>, %arg6: memref<64x64xf32, #tpu.memory_space<vmem>>, %arg7: memref<64x1xf32, #tpu.memory_space<vmem>>, %arg8: memref<64x64xf32, #tpu.memory_space<vmem>>, %arg9: memref<64x1xf32, #tpu.memory_space<vmem>>, %arg10: memref<3x64xf32, #tpu.memory_space<vmem>>, %arg11: memref<3x1xf32, #tpu.memory_space<vmem>>, %arg12: memref<3x128xf32, #tpu.memory_space<vmem>>) attributes {dimension_semantics = [#tpu.dimension_semantics<parallel>], iteration_bounds = array<i64: 1>, scalar_prefetch = 0 : i64, scratch_operands = 0 : i64, tpu.core_type = #tpu.core_type<tc>, window_params = [{transform_indices = @transform_0, window_bounds = array<i64: 5, 128>}, {transform_indices = @transform_1, window_bounds = array<i64: 3, 128>}, {pipeline_mode = #tpu.pipeline_mode<synchronous>, transform_indices = @transform_2, window_bounds = array<i64: 64, 5>}, {pipeline_mode = #tpu.pipeline_mode<synchronous>, transform_indices = @transform_3, window_bounds = array<i64: 64, 3>}, {pipeline_mode = #tpu.pipeline_mode<synchronous>, transform_indices = @transform_4, window_bounds = array<i64: 64, 1>}, {pipeline_mode = #tpu.pipeline_mode<synchronous>, transform_indices = @transform_5, window_bounds = array<i64: 64, 64>}, {pipeline_mode = #tpu.pipeline_mode<synchronous>, transform_indices = @transform_6, window_bounds = array<i64: 64, 1>}, {pipeline_mode = #tpu.pipeline_mode<synchronous>, transform_indices = @transform_7, window_bounds = array<i64: 64, 64>}, {pipeline_mode = #tpu.pipeline_mode<synchronous>, transform_indices = @transform_8, window_bounds = array<i64: 64, 1>}, {pipeline_mode = #tpu.pipeline_mode<synchronous>, transform_indices = @transform_9, window_bounds = array<i64: 3, 64>}, {pipeline_mode = #tpu.pipeline_mode<synchronous>, transform_indices = @transform_10, window_bounds = array<i64: 3, 1>}, {transform_indices = @transform_11, window_bounds = array<i64: 3, 128>}]} {
    %c0 = arith.constant 0 : index
    %c0_0 = arith.constant 0 : index
    %0 = vector.load %arg2[%c0, %c0_0] : memref<3x128xf32, #tpu.memory_space<vmem>>, vector<3x128xf32>
    %c0_1 = arith.constant 0 : index
    %c0_2 = arith.constant 0 : index
    %1 = vector.load %arg1[%c0_1, %c0_2] : memref<5x128xf32, #tpu.memory_space<vmem>>, vector<5x128xf32>
    %c0_3 = arith.constant 0 : index
    %c0_4 = arith.constant 0 : index
    %2 = vector.load %arg3[%c0_3, %c0_4] : memref<64x5xf32, #tpu.memory_space<vmem>>, vector<64x5xf32>
    %cst = arith.constant dense<0.000000e+00> : vector<64x128xf32>
    %3 = tpu.matmul %2, %1, %cst {dimension_numbers = #tpu.dot_dimension_numbers<[1], [0], [0], [1], [0, 0, 1, 1], [], []>} : vector<64x5xf32>, vector<5x128xf32>, vector<64x128xf32> -> vector<64x128xf32>
    %c0_5 = arith.constant 0 : index
    %c0_6 = arith.constant 0 : index
    %4 = vector.load %arg4[%c0_5, %c0_6] : memref<64x3xf32, #tpu.memory_space<vmem>>, vector<64x3xf32>
    %cst_7 = arith.constant dense<0.000000e+00> : vector<64x128xf32>
    %5 = tpu.matmul %4, %0, %cst_7 {dimension_numbers = #tpu.dot_dimension_numbers<[1], [0], [0], [1], [0, 0, 1, 1], [], []>} : vector<64x3xf32>, vector<3x128xf32>, vector<64x128xf32> -> vector<64x128xf32>
    %6 = arith.addf %3, %5 : vector<64x128xf32>
    %c0_8 = arith.constant 0 : index
    %c0_9 = arith.constant 0 : index
    %7 = vector.load %arg5[%c0_8, %c0_9] : memref<64x1xf32, #tpu.memory_space<vmem>>, vector<64x1xf32>
    %8 = vector.broadcast %7 : vector<64x1xf32> to vector<64x128xf32>
    %9 = arith.addf %6, %8 : vector<64x128xf32>
    %cst_10 = arith.constant 0.000000e+00 : f32
    %10 = vector.broadcast %cst_10 : f32 to vector<64x128xf32>
    %11 = arith.cmpf oge, %9, %10 : vector<64x128xf32>
    %cst_11 = arith.constant 0.00999999977 : f32
    %12 = vector.broadcast %cst_11 : f32 to vector<64x128xf32>
    %13 = arith.mulf %12, %9 : vector<64x128xf32>
    %14 = arith.select %11, %9, %13 : vector<64x128xi1>, vector<64x128xf32>
    %c0_12 = arith.constant 0 : index
    %c0_13 = arith.constant 0 : index
    %15 = vector.load %arg6[%c0_12, %c0_13] : memref<64x64xf32, #tpu.memory_space<vmem>>, vector<64x64xf32>
    %cst_14 = arith.constant dense<0.000000e+00> : vector<64x128xf32>
    %16 = tpu.matmul %15, %14, %cst_14 {dimension_numbers = #tpu.dot_dimension_numbers<[1], [0], [0], [1], [0, 0, 1, 1], [], []>} : vector<64x64xf32>, vector<64x128xf32>, vector<64x128xf32> -> vector<64x128xf32>
    %c0_15 = arith.constant 0 : index
    %c0_16 = arith.constant 0 : index
    %17 = vector.load %arg7[%c0_15, %c0_16] : memref<64x1xf32, #tpu.memory_space<vmem>>, vector<64x1xf32>
    %18 = vector.broadcast %17 : vector<64x1xf32> to vector<64x128xf32>
    %19 = arith.addf %16, %18 : vector<64x128xf32>
    %cst_17 = arith.constant 0.000000e+00 : f32
    %20 = vector.broadcast %cst_17 : f32 to vector<64x128xf32>
    %21 = arith.cmpf oge, %19, %20 : vector<64x128xf32>
    %cst_18 = arith.constant 0.00999999977 : f32
    %22 = vector.broadcast %cst_18 : f32 to vector<64x128xf32>
    %23 = arith.mulf %22, %19 : vector<64x128xf32>
    %24 = arith.select %21, %19, %23 : vector<64x128xi1>, vector<64x128xf32>
    %c0_19 = arith.constant 0 : index
    %c0_20 = arith.constant 0 : index
    %25 = vector.load %arg8[%c0_19, %c0_20] : memref<64x64xf32, #tpu.memory_space<vmem>>, vector<64x64xf32>
    %cst_21 = arith.constant dense<0.000000e+00> : vector<64x128xf32>
    %26 = tpu.matmul %25, %24, %cst_21 {dimension_numbers = #tpu.dot_dimension_numbers<[1], [0], [0], [1], [0, 0, 1, 1], [], []>} : vector<64x64xf32>, vector<64x128xf32>, vector<64x128xf32> -> vector<64x128xf32>
    %c0_22 = arith.constant 0 : index
    %c0_23 = arith.constant 0 : index
    %27 = vector.load %arg9[%c0_22, %c0_23] : memref<64x1xf32, #tpu.memory_space<vmem>>, vector<64x1xf32>
    %28 = vector.broadcast %27 : vector<64x1xf32> to vector<64x128xf32>
    %29 = arith.addf %26, %28 : vector<64x128xf32>
    %cst_24 = arith.constant 0.000000e+00 : f32
    %30 = vector.broadcast %cst_24 : f32 to vector<64x128xf32>
    %31 = arith.cmpf oge, %29, %30 : vector<64x128xf32>
    %cst_25 = arith.constant 0.00999999977 : f32
    %32 = vector.broadcast %cst_25 : f32 to vector<64x128xf32>
    %33 = arith.mulf %32, %29 : vector<64x128xf32>
    %34 = arith.select %31, %29, %33 : vector<64x128xi1>, vector<64x128xf32>
    %c0_26 = arith.constant 0 : index
    %c0_27 = arith.constant 0 : index
    %35 = vector.load %arg10[%c0_26, %c0_27] : memref<3x64xf32, #tpu.memory_space<vmem>>, vector<3x64xf32>
    %cst_28 = arith.constant dense<0.000000e+00> : vector<3x128xf32>
    %36 = tpu.matmul %35, %34, %cst_28 {dimension_numbers = #tpu.dot_dimension_numbers<[1], [0], [0], [1], [0, 0, 1, 1], [], []>} : vector<3x64xf32>, vector<64x128xf32>, vector<3x128xf32> -> vector<3x128xf32>
    %c0_29 = arith.constant 0 : index
    %c0_30 = arith.constant 0 : index
    %37 = vector.load %arg11[%c0_29, %c0_30] : memref<3x1xf32, #tpu.memory_space<vmem>>, vector<3x1xf32>
    %38 = vector.broadcast %37 : vector<3x1xf32> to vector<3x128xf32>
    %39 = arith.addf %36, %38 : vector<3x128xf32>
    %40 = tpu.iota {dimensions = array<i32: 0>} : vector<3x128xi32>
    %cst_31 = arith.constant 0.000000e+00 : f32
    %41 = vector.broadcast %cst_31 : f32 to vector<3x128xf32>
    %c1_i32 = arith.constant 1 : i32
    %42 = vector.broadcast %c1_i32 : i32 to vector<3x128xi32>
    %43 = arith.cmpi eq, %40, %42 : vector<3x128xi32>
    %cst_32 = arith.constant -1.000000e+00 : f32
    %44 = vector.broadcast %cst_32 : f32 to vector<3x128xf32>
    %45 = arith.select %43, %44, %41 : vector<3x128xi1>, vector<3x128xf32>
    %c2_i32 = arith.constant 2 : i32
    %46 = vector.broadcast %c2_i32 : i32 to vector<3x128xi32>
    %47 = arith.cmpi eq, %40, %46 : vector<3x128xi32>
    %cst_33 = arith.constant 0.000000e+00 : f32
    %48 = vector.broadcast %cst_33 : f32 to vector<3x128xf32>
    %49 = arith.select %47, %48, %45 : vector<3x128xi1>, vector<3x128xf32>
    %50 = arith.maximumf %39, %49 : vector<3x128xf32>
    %51 = arith.addf %0, %50 : vector<3x128xf32>
    %c0_34 = arith.constant 0 : index
    %c0_35 = arith.constant 0 : index
    %52 = vector.load %arg12[%c0_34, %c0_35] : memref<3x128xf32, #tpu.memory_space<vmem>>, vector<3x128xf32>
    tpu.vector_store %arg12[%c0_34, %c0_35], %51 {strides = array<i32>} : memref<3x128xf32, #tpu.memory_space<vmem>>, vector<3x128xf32>,
    return
  }
  func.func @transform_0(%arg0: i32) -> (i32, i32) {
    %c0_i32 = arith.constant 0 : i32
    %c0_i32_0 = arith.constant 0 : i32
    return %c0_i32, %arg0 : i32, i32
  }
  func.func @transform_1(%arg0: i32) -> (i32, i32) {
    %c0_i32 = arith.constant 0 : i32
    %c0_i32_0 = arith.constant 0 : i32
    return %c0_i32, %arg0 : i32, i32
  }
  func.func @transform_2(%arg0: i32) -> (i32, i32) {
    %c0_i32 = arith.constant 0 : i32
    %c0_i32_0 = arith.constant 0 : i32
    %c0_i32_1 = arith.constant 0 : i32
    return %c0_i32, %c0_i32_0 : i32, i32
  }
  func.func @transform_3(%arg0: i32) -> (i32, i32) {
    %c0_i32 = arith.constant 0 : i32
    %c0_i32_0 = arith.constant 0 : i32
    %c0_i32_1 = arith.constant 0 : i32
    return %c0_i32, %c0_i32_0 : i32, i32
  }
  func.func @transform_4(%arg0: i32) -> (i32, i32) {
    %c0_i32 = arith.constant 0 : i32
    %c0_i32_0 = arith.constant 0 : i32
    %c0_i32_1 = arith.constant 0 : i32
    return %c0_i32, %c0_i32_0 : i32, i32
  }
  func.func @transform_5(%arg0: i32) -> (i32, i32) {
    %c0_i32 = arith.constant 0 : i32
    %c0_i32_0 = arith.constant 0 : i32
    %c0_i32_1 = arith.constant 0 : i32
    return %c0_i32, %c0_i32_0 : i32, i32
  }
  func.func @transform_6(%arg0: i32) -> (i32, i32) {
    %c0_i32 = arith.constant 0 : i32
    %c0_i32_0 = arith.constant 0 : i32
    %c0_i32_1 = arith.constant 0 : i32
    return %c0_i32, %c0_i32_0 : i32, i32
  }
  func.func @transform_7(%arg0: i32) -> (i32, i32) {
    %c0_i32 = arith.constant 0 : i32
    %c0_i32_0 = arith.constant 0 : i32
    %c0_i32_1 = arith.constant 0 : i32
    return %c0_i32, %c0_i32_0 : i32, i32
  }
  func.func @transform_8(%arg0: i32) -> (i32, i32) {
    %c0_i32 = arith.constant 0 : i32
    %c0_i32_0 = arith.constant 0 : i32
    %c0_i32_1 = arith.constant 0 : i32
    return %c0_i32, %c0_i32_0 : i32, i32
  }
  func.func @transform_9(%arg0: i32) -> (i32, i32) {
    %c0_i32 = arith.constant 0 : i32
    %c0_i32_0 = arith.constant 0 : i32
    %c0_i32_1 = arith.constant 0 : i32
    return %c0_i32, %c0_i32_0 : i32, i32
  }
  func.func @transform_10(%arg0: i32) -> (i32, i32) {
    %c0_i32 = arith.constant 0 : i32
    %c0_i32_0 = arith.constant 0 : i32
    %c0_i32_1 = arith.constant 0 : i32
    return %c0_i32, %c0_i32_0 : i32, i32
  }
  func.func @transform_11(%arg0: i32) -> (i32, i32) {
    %c0_i32 = arith.constant 0 : i32
    %c0_i32_0 = arith.constant 0 : i32
    return %c0_i32, %arg0 : i32, i32
  }
}

</mosaic_0001>

<bundles_post_ra>
// kernel: tpu_custom_call.1
= control target key start
LH: loop header
LB: loop body
LE: loop exit
PB: predicated region body
PF: predicated region fallthrough
CT: control target
= control target key end

     0   :  { %vm82_vm0 = vcmask 1042432   ;;  %vm57_vm1 = vcmask 23552   ;;  %vm216_vm2 = vcmask 1044480   ;;  %v1207_v7 = vmov 0   ;;  %s1504_s0 = inlined_call_operand.vmem [shape: f32[5,8], index: 0, kind: input, shape index: {}]   ;;  %s1505_s1 = inlined_call_operand.vmem [shape: f32[3,8], index: 1, kind: input, shape index: {}]   ;;  %s1506_s2 = inlined_call_operand.vmem [shape: f32[64,5], index: 2, kind: input, shape index: {}]   ;;  %s1507_s3 = inlined_call_operand.vmem [shape: f32[64,3], index: 3, kind: input, shape index: {}]   ;;  %s1508_s4 = inlined_call_operand.vmem [shape: f32[64,1], index: 4, kind: input, shape index: {}]   ;;  %s1509_s5 = inlined_call_operand.vmem [shape: f32[64,64], index: 5, kind: input, shape index: {}]   ;;  %s1510_s6 = inlined_call_operand.vmem [shape: f32[64,1], index: 6, kind: input, shape index: {}]   ;;  %s1511_s7 = inlined_call_operand.vmem [shape: f32[64,64], index: 7, kind: input, shape index: {}]   ;;  %s1512_s8 = inlined_call_operand.vmem [shape: f32[64,1], index: 8, kind: input, shape index: {}]   ;;  %s1513_s9 = inlined_call_operand.vmem [shape: f32[3,64], index: 9, kind: input, shape index: {}]   ;;  %s1514_s10 = inlined_call_operand.vmem [shape: f32[3,1], index: 10, kind: input, shape index: {}]   ;;  %s1515_s11 = inlined_call_operand.hbm [shape: f32[3,8], index: 11, kind: output, shape index: {}]  }
   0x1   :  { %v1275_v0 = vld [vmem:[%s1505_s1] sm:$0x7]  ;;  %v50_v2 = vld [vmem:[%s1507_s3 + $0x8] sm:$0xff]  ;;  %v51_v4 = vld [vmem:[%s1507_s3 + $0x10] sm:$0xff]  ;;  %1181 = vset.pattern.permute.xlu0 %v1207_v7  ;;  %1182 = vset.pattern.permute.xlu1 %v1207_v7  ;;  %vm191_vm3 = vcmask 39936  }
   0x2   :  { %v49_v1 = vld [vmem:[%s1507_s3] sm:$0xff]  ;;  %1021 = vmatprep.subr.msk.mxu0 %vm82_vm0, %v1275_v0  ;;  %v52_v5 = vld [vmem:[%s1507_s3 + $0x18] sm:$0xff]  ;;  %v327_v9 = vld [vmem:[%s1508_s4 + $0x10] sm:$0xff] }
   0x3   :  { %1023 = vmatprep.mubr.msk.f32.mxu0 %vm57_vm1, %v49_v1  ;;  %v40_v3 = vld [vmem:[%s1504_s0] sm:$0x1f]  ;;  %1022 = vmatpush3.msk.msra.mxu0 %vm82_vm0, %v1275_v0  ;;  %v54_v10 = vld [vmem:[%s1507_s3 + $0x28] sm:$0xff]  ;;  %v55_v12 = vld [vmem:[%s1507_s3 + $0x30] sm:$0xff] }
   0x4   :  { %1024 = vmatmul.mubr.msk.f32.vlgmr.msra.gmra.mrb[0].mxu0 %vm57_vm1, %v50_v2  ;;  %1035 = vmatprep.subr.msk.mxu0 %vm216_vm2, %v40_v3  ;;  %v53_v6 = vld [vmem:[%s1507_s3 + $0x20] sm:$0xff]  ;;  %v326_v11 = vld [vmem:[%s1508_s4 + $0x8] sm:$0xff]  ;;  %v328_v13 = vld [vmem:[%s1508_s4 + $0x18] sm:$0xff] }
   0x5   :  { %1036 = vmatpush3.msk.msra.mxu0 %vm216_vm2, %v40_v3  ;;  %1026 = vmatprep.mubr.msk.f32.mxu0 %vm57_vm1, %v51_v4  ;;  %v325_v8 = vld [vmem:[%s1508_s4] sm:$0xff]  ;;  %v56_v14 = vld [vmem:[%s1507_s3 + $0x38] sm:$0xff]  ;;  %v330_v17 = vld [vmem:[%s1508_s4 + $0x28] sm:$0xff] }
   0x6   :  { %335 = vperm.xlu0 %1181, %v325_v8   ;;  %345 = vperm.xlu1 %1182, %v327_v9   ;;  %v329_v15 = vld [vmem:[%s1508_s4 + $0x20] sm:$0xff] }
   0x7   :  { %v41_v16 = vld [vmem:[%s1506_s2] sm:$0xff] }
   0x8   :  { %1027 = vmatmul.mubr.msk.f32.gmra.mrb[2].mxu0 %vm57_vm1, %v52_v5 }
   0x9   :  { %1029 = vmatprep.mubr.msk.f32.mxu0 %vm57_vm1, %v53_v6 }
   0xa   :  { %340 = vperm.xlu0 %1181, %v326_v11   ;;  %350 = vperm.xlu1 %1182, %v328_v13  }
   0xc   :  { %1030 = vmatmul.mubr.msk.f32.gmra.mrb[4].mxu0 %vm57_vm1, %v54_v10 }
   0xd   :  { %1032 = vmatprep.mubr.msk.f32.mxu0 %vm57_vm1, %v55_v12 }
   0xe   :  { %16 = vsyncpa [#allocation3], 0  ;;  %355 = vperm.xlu0 %1181, %v329_v15   ;;  %v42_v18 = vld [vmem:[%s1506_s2 + $0x8] sm:$0xff]  ;;  %v331_v19 = vld [vmem:[%s1508_s4 + $0x30] sm:$0xff]  ;;  %360 = vperm.xlu1 %1182, %v330_v17   ;;  %vm461_vm4 = vcmask 523264   ;;  %s1211_s15 = smov [#allocation2]  }
   0xf   :  { %v43_v20 = vld [vmem:[%s1506_s2 + $0x10] sm:$0xff]  ;;  %v332_v21 = vld [vmem:[%s1508_s4 + $0x38] sm:$0xff]  ;;  %v413_v23 = vld [vmem:[%s1510_s6] sm:$0xff]  ;;  %s919_s16 = sshll.u32 %s1211_s15, 4  ;;  %s920_s16 = int_to_ptr.vmem [resolvable:$true] %s919_s16 }
  0x10   :  { %1033 = vmatmul.mubr.msk.f32.gmra.mrb[6].mxu0 %vm57_vm1, %v56_v14  ;;  %v44_v22 = vld [vmem:[%s1506_s2 + $0x18] sm:$0xff]  ;;  %v45_v24 = vld [vmem:[%s1506_s2 + $0x20] sm:$0xff]  ;;  %v414_v25 = vld [vmem:[%s1510_s6 + $0x8] sm:$0xff]  ;;  %p1188_p1 = scmp.lt.s32.totalorder %s920_s16, %s920_s16 }
  0x11   :  { %1037 = vmatprep.mubr.msk.f32.mxu0 %vm191_vm3, %v41_v16  ;;  %v46_v26 = vld [vmem:[%s1506_s2 + $0x28] sm:$0xff]  ;;  %v415_v27 = vld [vmem:[%s1510_s6 + $0x10] sm:$0xff]  ;;  %v416_v29 = vld [vmem:[%s1510_s6 + $0x18] sm:$0xff] }
  0x12   :  { %365 = vperm.xlu0 %1181, %v331_v19   ;;  %370 = vperm.xlu1 %1182, %v332_v21   ;;  %v47_v28 = vld [vmem:[%s1506_s2 + $0x30] sm:$0xff]  ;;  %v48_v30 = vld [vmem:[%s1506_s2 + $0x38] sm:$0xff]  ;;  %v417_v31 = vld [vmem:[%s1510_s6 + $0x20] sm:$0xff] }
  0x13   :  { %v418_v32 = vld [vmem:[%s1510_s6 + $0x28] sm:$0xff]  ;;  %v419_v33 = vld [vmem:[%s1510_s6 + $0x30] sm:$0xff]  ;;  %v420_v34 = vld [vmem:[%s1510_s6 + $0x38] sm:$0xff] }
  0x14   :  { %1038 = vmatmul.mubr.msk.f32.vlgmr.msra.gmra.mrb[0].mxu0 %vm191_vm3, %v42_v18  ;;  %v623_v35 = vld [vmem:[%s1512_s8] sm:$0xff]  ;;  %v624_v36 = vld [vmem:[%s1512_s8 + $0x8] sm:$0xff]  ;;  %v625_v37 = vld [vmem:[%s1512_s8 + $0x10] sm:$0xff] }
  0x15   :  { %1040 = vmatprep.mubr.msk.f32.mxu0 %vm191_vm3, %v43_v20  ;;  %v626_v38 = vld [vmem:[%s1512_s8 + $0x18] sm:$0xff]  ;;  %v627_v39 = vld [vmem:[%s1512_s8 + $0x20] sm:$0xff]  ;;  %v628_v40 = vld [vmem:[%s1512_s8 + $0x28] sm:$0xff] }
  0x16   :  { %423 = vperm.xlu0 %1181, %v413_v23   ;;  %428 = vperm.xlu1 %1182, %v414_v25   ;;  %v629_v41 = vld [vmem:[%s1512_s8 + $0x30] sm:$0xff]  ;;  %v630_v42 = vld [vmem:[%s1512_s8 + $0x38] sm:$0xff]  ;;  %v825_v43 = vld [vmem:[%s1514_s10] sm:$0x7] }
  0x17   :  { %v405_v44 = vld [vmem:[%s1509_s5] sm:$0xff] }
  0x18   :  { %1041 = vmatmul.mubr.msk.f32.gmra.mrb[2].mxu0 %vm191_vm3, %v44_v22  ;;  %1065 = vmatprep.mubr.msk.f32.mxu1 %vm461_vm4, %v405_v44 }
  0x19   :  { %1043 = vmatprep.mubr.msk.f32.mxu0 %vm191_vm3, %v45_v24 }
  0x1a   :  { %433 = vperm.xlu0 %1181, %v415_v27   ;;  %438 = vperm.xlu1 %1182, %v416_v29   ;;  %v407_v27 = vld [vmem:[%s1509_s5 + $0x10] sm:$0xff]  ;;  %v409_v29 = vld [vmem:[%s1509_s5 + $0x20] sm:$0xff] }
  0x1c   :  { %1044 = vmatmul.mubr.msk.f32.gmra.mrb[4].mxu0 %vm191_vm3, %v46_v26  ;;  %v406_v26 = vld [vmem:[%s1509_s5 + $0x8] sm:$0xff] }
  0x1d   :  { %1046 = vmatprep.mubr.msk.f32.mxu0 %vm191_vm3, %v47_v28  ;;  %v408_v28 = vld [vmem:[%s1509_s5 + $0x18] sm:$0xff] }
  0x1e   :  { %443 = vperm.xlu0 %1181, %v417_v31   ;;  %448 = vperm.xlu1 %1182, %v418_v32   ;;  %v411_v31 = vld [vmem:[%s1509_s5 + $0x30] sm:$0xff]  ;;  %v412_v32 = vld [vmem:[%s1509_s5 + $0x38] sm:$0xff] }
  0x20   :  { %1047 = vmatmul.mubr.msk.f32.gmra.mrb[6].mxu0 %vm191_vm3, %v48_v30  ;;  %v410_v30 = vld [vmem:[%s1509_s5 + $0x28] sm:$0xff] }
  0x22   :  { %453 = vperm.xlu0 %1181, %v419_v33   ;;  %458 = vperm.xlu1 %1182, %v420_v34   ;;  %v615_v33 = vld [vmem:[%s1511_s7] sm:$0xff] }
  0x26   :  { %633 = vperm.xlu0 %1181, %v623_v35   ;;  %638 = vperm.xlu1 %1182, %v624_v36  }
  0x2a   :  { %643 = vperm.xlu0 %1181, %v625_v37   ;;  %648 = vperm.xlu1 %1182, %v626_v38  }
  0x2e   :  { %653 = vperm.xlu0 %1181, %v627_v39   ;;  %658 = vperm.xlu1 %1182, %v628_v40  }
  0x32   :  { %663 = vperm.xlu0 %1181, %v629_v41   ;;  %668 = vperm.xlu1 %1182, %v630_v42  }
  0x36   :  { %828 = vperm.xlu0 %1181, %v825_v43  }
  0x85   :  { %v336_v45 = vpop.permute.xlu0 %335  ;;  %v346_v46 = vpop.permute.xlu1 %345 }
  0x89   :  { %v341_v47 = vpop.permute.xlu0 %340  ;;  %v351_v48 = vpop.permute.xlu1 %350 }
  0x8d   :  { %v361_v59 = vpop.permute.xlu1 %360  ;;  %v356_v62 = vpop.permute.xlu0 %355 }
  0x91   :  { %v371_v11 = vpop.permute.xlu1 %370  ;;  %v366_v14 = vpop.permute.xlu0 %365 }
  0x95   :  { %v429_v34 = vpop.permute.xlu1 %428  ;;  %v424_v35 = vpop.permute.xlu0 %423 }
  0x99   :  { %v439_v36 = vpop.permute.xlu1 %438  ;;  %v434_v38 = vpop.permute.xlu0 %433 }
  0xe7   :  { %v1039_v49 = vpop.f32.mrb[0].mxu0 }
  0xe8   :  { %v374_v50 = vadd.f32 %v1039_v49, %v341_v47  ;;  %v286_v51 = vpop.f32.mrb[1].mxu0 }
  0xe9   :  { %v373_v52 = vadd.f32 %v336_v45, %v286_v51  ;;  %v444_v51 = vpop.permute.xlu0 %443 }
  0xea   :  { %v390_v53 = vmul.f32 0.01, %v374_v50  ;;  %vm382_vm5 = vcmp.ge.f32.partialorder %v374_v50, 0.0 }
  0xeb   :  { %v389_v54 = vmul.f32 0.01, %v373_v52  ;;  %v1042_v55 = vpop.f32.mrb[2].mxu0  ;;  %vm381_vm6 = vcmp.ge.f32.partialorder %v373_v52, 0.0 }
  0xec   :  { %v376_v56 = vadd.f32 %v1042_v55, %v351_v48  ;;  %v296_v57 = vpop.f32.mrb[3].mxu0  ;;  %v398_v58 = vsel %vm382_vm5, %v374_v50, %v390_v53  ;;  %v449_v48 = vpop.permute.xlu1 %448 }
  0xed   :  { %v375_v60 = vadd.f32 %v346_v46, %v296_v57  ;;  %v397_v61 = vsel %vm381_vm6, %v373_v52, %v389_v54  ;;  %vm1209_vm6 = vmmov 0  }
  0xee   :  { %vm384_vm7 = vcmp.ge.f32.partialorder %v376_v56, 0.0  ;;  %v392_v63 = vmul.f32 0.01, %v376_v56  ;;  %v1124_v1 = vpack.c.bf16 %v398_v58, %v397_v61 }
  0xef   :  { %vm383_vm8 = vcmp.ge.f32.partialorder %v375_v60, 0.0  ;;  %v391_v2 = vmul.f32 0.01, %v375_v60  ;;  %v1045_v3 = vpop.f32.mrb[4].mxu0 }
  0xf0   :  { %v378_v4 = vadd.f32 %v1045_v3, %v361_v59  ;;  %v306_v5 = vpop.f32.mrb[5].mxu0  ;;  %1125 = vmatprep.subr.bf16.mxu1 %v1124_v1  ;;  %v400_v6 = vsel %vm384_vm7, %v376_v56, %v392_v63  ;;  %v459_v63 = vpop.permute.xlu1 %458 }
  0xf1   :  { %v377_v7 = vadd.f32 %v356_v62, %v306_v5  ;;  %1127 = vmatpush3.bf16.msra.mxu1 %v1124_v1  ;;  %v399_v8 = vsel %vm383_vm8, %v375_v60, %v391_v2  ;;  %v454_v3 = vpop.permute.xlu0 %453 }
  0xf2   :  { %vm386_vm9 = vcmp.ge.f32.partialorder %v378_v4, 0.0  ;;  %v394_v9 = vmul.f32 0.01, %v378_v4  ;;  %v1128_v10 = vpack.c.bf16 %v400_v6, %v399_v8 }
  0xf3   :  { %vm385_vm10 = vcmp.ge.f32.partialorder %v377_v7, 0.0  ;;  %v393_v12 = vmul.f32 0.01, %v377_v7  ;;  %v1048_v13 = vpop.f32.mrb[6].mxu0 }
  0xf4   :  { %v380_v15 = vadd.f32 %v1048_v13, %v371_v11  ;;  %v316_v16 = vpop.f32.mrb[7].mxu0  ;;  %1129 = vmatprep.subr.bf16.mxu1 %v1128_v10  ;;  %v402_v17 = vsel %vm386_vm9, %v378_v4, %v394_v9 }
  0xf5   :  { %v379_v18 = vadd.f32 %v366_v14, %v316_v16  ;;  %1131 = vmatpush3.bf16.msra.mxu1 %v1128_v10  ;;  %v401_v19 = vsel %vm385_vm10, %v377_v7, %v393_v12  ;;  %v617_v16 = vld [vmem:[%s1511_s7 + $0x10] sm:$0xff] }
  0xf6   :  { %vm388_vm11 = vcmp.ge.f32.partialorder %v380_v15, 0.0  ;;  %v396_v20 = vmul.f32 0.01, %v380_v15  ;;  %v1132_v21 = vpack.c.bf16 %v402_v17, %v401_v19  ;;  %v618_v17 = vld [vmem:[%s1511_s7 + $0x18] sm:$0xff]  ;;  %v620_v19 = vld [vmem:[%s1511_s7 + $0x28] sm:$0xff] }
  0xf7   :  { %vm387_vm12 = vcmp.ge.f32.partialorder %v379_v18, 0.0  ;;  %v395_v22 = vmul.f32 0.01, %v379_v18 }
  0xf8   :  { %1133 = vmatprep.subr.bf16.mxu1 %v1132_v21  ;;  %v404_v23 = vsel %vm388_vm11, %v380_v15, %v396_v20  ;;  %v616_v15 = vld [vmem:[%s1511_s7 + $0x8] sm:$0xff]  ;;  %v621_v20 = vld [vmem:[%s1511_s7 + $0x30] sm:$0xff] }
  0xf9   :  { %1135 = vmatpush3.bf16.msra.mxu1 %v1132_v21  ;;  %v403_v24 = vsel %vm387_vm12, %v379_v18, %v395_v22  ;;  %v619_v18 = vld [vmem:[%s1511_s7 + $0x20] sm:$0xff]  ;;  %v622_v21 = vld [vmem:[%s1511_s7 + $0x38] sm:$0xff]  ;;  %v1208_v22 = vmov 0.0|0.0  }
  0xfa   :  { %v1136_v25 = vpack.c.bf16 %v404_v23, %v403_v24  ;;  %1156 = vmatprep.subr.bf16.mxu0 %v1208_v22  ;;  %v1210_v23 = vmov 0.0   ;;  %v639_v24 = vpop.permute.xlu1 %638 }
  0xfb   :  { %1121 = vmatprep.mubr.msk.f32.mxu0 %vm1209_vm6, %v1210_v23 }
  0xfc   :  { %1137 = vmatprep.subr.bf16.mxu1 %v1136_v25 }
  0xfd   :  { %1139 = vmatpush3.bf16.msra.mxu1 %v1136_v25  ;;  %v634_v25 = vpop.permute.xlu0 %633 }
 0x100   :  { %1066 = vmatmul.mubr.msk.f32.vlgmr.msra.gmra.mrb[0].mxu1 %vm461_vm4, %v406_v26  ;;  %v649_v26 = vpop.permute.xlu1 %648 }
 0x101   :  { %1068 = vmatprep.mubr.msk.f32.mxu1 %vm461_vm4, %v407_v27 }
 0x104   :  { %1069 = vmatmul.mubr.msk.f32.gmra.mrb[2].mxu1 %vm461_vm4, %v408_v28  ;;  %v644_v28 = vpop.permute.xlu0 %643 }
 0x105   :  { %1071 = vmatprep.mubr.msk.f32.mxu1 %vm461_vm4, %v409_v29 }
 0x108   :  { %1072 = vmatmul.mubr.msk.f32.gmra.mrb[4].mxu1 %vm461_vm4, %v410_v30 }
 0x109   :  { %1074 = vmatprep.mubr.msk.f32.mxu1 %vm461_vm4, %v411_v31 }
 0x10c   :  { %1075 = vmatmul.mubr.msk.f32.gmra.mrb[6].mxu1 %vm461_vm4, %v412_v32 }
 0x10d   :  { %1093 = vmatprep.mubr.msk.f32.mxu1 %vm461_vm4, %v615_v33 }
 0x1d3   :  { %v1067_v37 = vpop.f32.mrb[0].mxu1 }
 0x1d4   :  { %v558_v39 = vadd.f32 %v1067_v37, %v429_v34  ;;  %v552_v40 = vpop.f32.mrb[1].mxu1 }
 0x1d5   :  { %v553_v41 = vadd.f32 %v552_v40, %v424_v35 }
 0x1d6   :  { %vm592_vm13 = vcmp.ge.f32.partialorder %v558_v39, 0.0  ;;  %v600_v42 = vmul.f32 0.01, %v558_v39 }
 0x1d7   :  { %vm591_vm14 = vcmp.ge.f32.partialorder %v553_v41, 0.0  ;;  %v599_v43 = vmul.f32 0.01, %v553_v41  ;;  %v1070_v44 = vpop.f32.mrb[2].mxu1 }
 0x1d8   :  { %v568_v45 = vadd.f32 %v1070_v44, %v439_v36  ;;  %v562_v46 = vpop.f32.mrb[3].mxu1  ;;  %v608_v47 = vsel %vm592_vm13, %v558_v39, %v600_v42 }
 0x1d9   :  { %v563_v49 = vadd.f32 %v562_v46, %v434_v38  ;;  %v607_v50 = vsel %vm591_vm14, %v553_v41, %v599_v43  ;;  %v659_v38 = vpop.permute.xlu1 %658  ;;  %v654_v41 = vpop.permute.xlu0 %653 }
 0x1da   :  { %vm594_vm15 = vcmp.ge.f32.partialorder %v568_v45, 0.0  ;;  %v602_v52 = vmul.f32 0.01, %v568_v45  ;;  %v1140_v53 = vpack.c.bf16 %v608_v47, %v607_v50 }
 0x1db   :  { %vm593_vm0 = vcmp.ge.f32.partialorder %v563_v49, 0.0  ;;  %v601_v54 = vmul.f32 0.01, %v563_v49  ;;  %v1073_v55 = vpop.f32.mrb[4].mxu1 }
 0x1dc   :  { %v578_v56 = vadd.f32 %v1073_v55, %v449_v48  ;;  %v572_v57 = vpop.f32.mrb[5].mxu1  ;;  %1141 = vmatprep.subr.bf16.mxu1 %v1140_v53  ;;  %v610_v58 = vsel %vm594_vm15, %v568_v45, %v602_v52 }
 0x1dd   :  { %v573_v59 = vadd.f32 %v572_v57, %v444_v51  ;;  %1143 = vmatpush3.bf16.msra.mxu1 %v1140_v53  ;;  %v609_v60 = vsel %vm593_vm0, %v563_v49, %v601_v54  ;;  %v669_v53 = vpop.permute.xlu1 %668 }
 0x1de   :  { %vm596_vm1 = vcmp.ge.f32.partialorder %v578_v56, 0.0  ;;  %v604_v61 = vmul.f32 0.01, %v578_v56  ;;  %v1144_v62 = vpack.c.bf16 %v610_v58, %v609_v60 }
 0x1df   :  { %vm595_vm2 = vcmp.ge.f32.partialorder %v573_v59, 0.0  ;;  %v603_v1 = vmul.f32 0.01, %v573_v59  ;;  %v1076_v2 = vpop.f32.mrb[6].mxu1 }
 0x1e0   :  { %v588_v4 = vadd.f32 %v1076_v2, %v459_v63  ;;  %v582_v5 = vpop.f32.mrb[7].mxu1  ;;  %1145 = vmatprep.subr.bf16.mxu1 %v1144_v62  ;;  %v612_v6 = vsel %vm596_vm1, %v578_v56, %v604_v61  ;;  %v664_v56 = vpop.permute.xlu0 %663 }
 0x1e1   :  { %v583_v7 = vadd.f32 %v582_v5, %v454_v3  ;;  %1147 = vmatpush3.bf16.msra.mxu1 %v1144_v62  ;;  %v611_v8 = vsel %vm595_vm2, %v573_v59, %v603_v1  ;;  %v824_v5 = vld [vmem:[%s1513_s9] sm:$0x7]  ;;  %s1183_s9 = scalar_lea.vmem %s920_s16, 64 }
 0x1e2   :  { %vm598_vm3 = vcmp.ge.f32.partialorder %v588_v4, 0.0  ;;  %v606_v9 = vmul.f32 0.01, %v588_v4  ;;  %v1148_v10 = vpack.c.bf16 %v612_v6, %v611_v8  ;;  %v904_v6 = vlaneseq  ;;  %p1184_p0 = scmp.ne.s32.totalorder %s920_s16, %s1183_s9  ;;  %p1189_p2 = scmp.lt.s32.totalorder %s1183_s9, %s1183_s9 }
 0x1e3   :  { %vm597_vm5 = vcmp.ge.f32.partialorder %v583_v7, 0.0  ;;  %v605_v11 = vmul.f32 0.01, %v583_v7 }
 0x1e4   :  { %1149 = vmatprep.subr.bf16.mxu1 %v1148_v10  ;;  %v614_v12 = vsel %vm598_vm3, %v588_v4, %v606_v9  ;;  %v829_v9 = vpop.permute.xlu0 %828  ;;  %p1190_p3 = por %p1189_p2, %p1188_p1 }
 0x1e5   :  { %1151 = vmatpush3.bf16.msra.mxu1 %v1148_v10  ;;  %v613_v13 = vsel %vm597_vm5, %v583_v7, %v605_v11  ;;  %v905_v7 = vshrl.u32 %v904_v6, 7 }
 0x1e6   :  { %v1152_v14 = vpack.c.bf16 %v614_v12, %v613_v13  ;;  %p1191_p4 = pnand %p1190_p3, %p1184_p0 }
 0x1e7   :  { %vm906_vm15 = vcmp.eq.s32.totalorder %v905_v7, 1  ;;  %vm908_vm0 = vcmp.eq.s32.totalorder %v905_v7, 2 }
 0x1e8   :  { %1153 = vmatprep.subr.bf16.mxu1 %v1152_v14  ;;  %v907_v8 = vsel %vm906_vm15, -1.0, %v1210_v23 }
 0x1e9   :  { %1155 = vmatpush3.bf16.msra.mxu1 %v1152_v14  ;;  %v909_v11 = vsel %vm908_vm0, 0.0, %v907_v8 }
 0x1ec   :  { %1094 = vmatmul.mubr.msk.f32.vlgmr.msra.gmra.mrb[8].mxu1 %vm461_vm4, %v616_v15 }
 0x1ed   :  { %1096 = vmatprep.mubr.msk.f32.mxu1 %vm461_vm4, %v617_v16 }
 0x1f0   :  { %1097 = vmatmul.mubr.msk.f32.gmra.mrb[10].mxu1 %vm461_vm4, %v618_v17 }
 0x1f1   :  { %1099 = vmatprep.mubr.msk.f32.mxu1 %vm461_vm4, %v619_v18 }
 0x1f4   :  { %1100 = vmatmul.mubr.msk.f32.gmra.mrb[12].mxu1 %vm461_vm4, %v620_v19 }
 0x1f5   :  { %1102 = vmatprep.mubr.msk.f32.mxu1 %vm461_vm4, %v621_v20 }
 0x1f8   :  { %1103 = vmatmul.mubr.msk.f32.gmra.mrb[14].mxu1 %vm461_vm4, %v622_v21 }
 0x2bf   :  { %v1095_v27 = vpop.f32.mrb[8].mxu1 }
 0x2c0   :  { %v767_v29 = vadd.f32 %v1095_v27, %v639_v24  ;;  %v761_v30 = vpop.f32.mrb[9].mxu1 }
 0x2c1   :  { %v762_v31 = vadd.f32 %v761_v30, %v634_v25 }
 0x2c2   :  { %vm801_vm7 = vcmp.ge.f32.partialorder %v767_v29, 0.0  ;;  %v809_v32 = vmul.f32 0.01, %v767_v29 }
 0x2c3   :  { %vm800_vm8 = vcmp.ge.f32.partialorder %v762_v31, 0.0  ;;  %v808_v33 = vmul.f32 0.01, %v762_v31  ;;  %v1098_v34 = vpop.f32.mrb[10].mxu1 }
 0x2c4   :  { %v817_v35 = vsel %vm801_vm7, %v767_v29, %v809_v32  ;;  %v777_v36 = vadd.f32 %v1098_v34, %v649_v26  ;;  %v771_v37 = vpop.f32.mrb[11].mxu1 }
 0x2c5   :  { %v816_v39 = vsel %vm800_vm8, %v762_v31, %v808_v33  ;;  %v772_v40 = vadd.f32 %v771_v37, %v644_v28 }
 0x2c6   :  { %v1157_v42 = vpack.c.bf16 %v817_v35, %v816_v39  ;;  %vm803_vm9 = vcmp.ge.f32.partialorder %v777_v36, 0.0  ;;  %v811_v43 = vmul.f32 0.01, %v777_v36 }
 0x2c7   :  { %vm802_vm10 = vcmp.ge.f32.partialorder %v772_v40, 0.0  ;;  %v810_v44 = vmul.f32 0.01, %v772_v40  ;;  %v1101_v45 = vpop.f32.mrb[12].mxu1 }
 0x2c8   :  { %v819_v46 = vsel %vm803_vm9, %v777_v36, %v811_v43  ;;  %v787_v47 = vadd.f32 %v1101_v45, %v659_v38  ;;  %v781_v48 = vpop.f32.mrb[13].mxu1  ;;  %1158 = vmatpush3.bf16.msra.mxu0 %v1157_v42 }
 0x2c9   :  { %v818_v49 = vsel %vm802_vm10, %v772_v40, %v810_v44  ;;  %v782_v50 = vadd.f32 %v781_v48, %v654_v41  ;;  %1159 = vmatprep.subr.bf16.mxu0 %v1208_v22 }
 0x2ca   :  { %v1160_v51 = vpack.c.bf16 %v819_v46, %v818_v49  ;;  %vm805_vm11 = vcmp.ge.f32.partialorder %v787_v47, 0.0  ;;  %v813_v52 = vmul.f32 0.01, %v787_v47 }
 0x2cb   :  { %vm804_vm12 = vcmp.ge.f32.partialorder %v782_v50, 0.0  ;;  %v812_v54 = vmul.f32 0.01, %v782_v50  ;;  %v1104_v55 = vpop.f32.mrb[14].mxu1 }
 0x2cc   :  { %v821_v57 = vsel %vm805_vm11, %v787_v47, %v813_v52  ;;  %v797_v58 = vadd.f32 %v1104_v55, %v669_v53  ;;  %v791_v59 = vpop.f32.mrb[15].mxu1  ;;  %1161 = vmatpush3.bf16.msra.mxu0 %v1160_v51 }
 0x2cd   :  { %v820_v60 = vsel %vm804_vm12, %v782_v50, %v812_v54  ;;  %v792_v61 = vadd.f32 %v791_v59, %v664_v56  ;;  %1162 = vmatprep.subr.bf16.mxu0 %v1208_v22 }
 0x2ce   :  { %v1163_v62 = vpack.c.bf16 %v821_v57, %v820_v60  ;;  %vm807_vm13 = vcmp.ge.f32.partialorder %v797_v58, 0.0  ;;  %v815_v63 = vmul.f32 0.01, %v797_v58 }
 0x2cf   :  { %vm806_vm14 = vcmp.ge.f32.partialorder %v792_v61, 0.0  ;;  %v814_v1 = vmul.f32 0.01, %v792_v61 }
 0x2d0   :  { %v823_v2 = vsel %vm807_vm13, %v797_v58, %v815_v63  ;;  %1164 = vmatpush3.bf16.msra.mxu0 %v1163_v62 }
 0x2d1   :  { %v822_v3 = vsel %vm806_vm14, %v792_v61, %v814_v1  ;;  %1165 = vmatprep.subr.bf16.mxu0 %v1208_v22 }
 0x2d2   :  { %v1166_v4 = vpack.c.bf16 %v823_v2, %v822_v3 }
 0x2d4   :  { %1167 = vmatpush3.bf16.msra.mxu0 %v1166_v4 }
 0x2d7   :  { %1122 = vmatmul.mubr.msk.f32.vlgmr.msra.gmra.mrb[8].mxu0 %vm461_vm4, %v824_v5 }
 0x3aa   :  { %v900_v10 = vpop.f32.mrb[8].mxu0 }
 0x3ab   :  { %v901_v12 = vadd.f32 %v900_v10, %v829_v9  ;;  %v1123_v13 = vpop.f32.mrb[9].mxu0 }
 0x3ad   :  { %v910_v14 = vmax.f32 %v901_v12, %v909_v11 }
 0x3af   :  { %v911_v15 = vadd.f32 %v910_v14, %v1275_v0 }
 0x3b1   :  { %912 = vst [vmem:[#allocation2] sm:$0x7] %v911_v15 }
 0x3b2   :  { %1194 = shalt.err (!%p1191_p4)
}
 0x3b3   :  { %s1195_s2 = scalar_lea.hbm %s1515_s11, 64 }
 0x3b4   :  { %p1196_p5 = scmp.ne.s32.totalorder %s1515_s11, %s1195_s2  ;;  %p1199_p6 = scmp.lt.u32.totalorder %s1195_s2, %s1515_s11 }
 0x3b6   :  { %p1201_p7 = pnand %p1199_p6, %p1196_p5 }
 0x3b8   :  { %1204 = shalt.err (!%p1201_p7)
}
 0x3b9   :  { %922 = dma.vmem_to_hbm [thread:$0]  %s920_s16, 64, %s1515_s11, [#allocation3]  }
 0x3ba   :  { %1205 = dma.done.wait [#allocation3], 64  }
 0x3bb   :  { %1206 = vsyncadd [#allocation3], 4294967232 }
 0x3bc   :  { %926 = vsyncpa [#allocation3], 1 }

</bundles_post_ra>
